<compile_context>
chip_gen: v5e
topology: v5e:2x2
jax: 0.10.0
libtpu: 0.0.40
codegen_flags: <defaults>
</compile_context>

<pallas_src>
import math

import jax
import jax.numpy as jnp
from jax.experimental import pallas as pl
from jax.experimental.pallas import tpu as pltpu

_LANE = 128
_SUBLANE = 8
_MAX_COLS = 1024                      # lane-dense width cap
_TARGET_BLOCK_BYTES = 2 * 1024 * 1024  # ~2 MiB blocks: safe on v7x's 64 MiB VMEM


def _copy_kernel(x_ref, o_ref):
    # Pass-through: Application defines no parameters and no transformation.
    o_ref[...] = x_ref[...]


def _choose_layout(total, itemsize):
    """Pick a lane-dense (rows, cols) view and a row-tile size, or None."""
    if total % _LANE != 0:
        return None
    cols = _LANE
    while cols * 2 <= _MAX_COLS and total % (cols * 2) == 0:
        cols *= 2
    rows = total // cols

    # Row tile: a multiple of 8 that divides rows, sized so one block ~2 MiB.
    cap = max(_SUBLANE, _TARGET_BLOCK_BYTES // (cols * itemsize))
    cap = (cap // _SUBLANE) * _SUBLANE
    tile_r = rows
    if rows % _SUBLANE == 0 and rows > cap:
        for cand in range(cap, _SUBLANE - 1, -_SUBLANE):
            if rows % cand == 0:
                tile_r = cand
                break
    return rows, cols, tile_r


def _tiled_identity_copy(x2, rows, cols, tile_r):
    return pl.pallas_call(
        _copy_kernel,
        out_shape=jax.ShapeDtypeStruct((rows, cols), x2.dtype),
        grid=(rows // tile_r,),
        in_specs=[pl.BlockSpec((tile_r, cols), lambda i: (i, 0))],
        out_specs=pl.BlockSpec((tile_r, cols), lambda i: (i, 0)),
        input_output_aliases={0: 0},
        compiler_params=pltpu.CompilerParams(
            dimension_semantics=("parallel",),
        ),
    )(x2)


@jax.jit
def application_forward(x: jax.Array) -> jax.Array:
    """Pallas implementation of Application's (abstract) forward: identity."""
    total = math.prod(x.shape)
    layout = _choose_layout(total, jnp.dtype(x.dtype).itemsize)
    if layout is None:
        # TODO(synk): element count not a multiple of 128 -> pure pass-through
        # (identity), no kernel launch needed.
        return x
    rows, cols, tile_r = layout
    x2 = x.reshape(rows, cols)           # lane-dense 2D view (layout plumbing)
    y2 = _tiled_identity_copy(x2, rows, cols, tile_r)
    return y2.reshape(x.shape)


if __name__ == "__main__":
    key = jax.random.PRNGKey(0)
    x = jax.random.normal(key, (2, 4, 16, 16), dtype=jnp.float32)  # NCHW

    out = application_forward(x)
    jax.block_until_ready(out)

    assert out.shape == x.shape and out.dtype == x.dtype
    assert bool(jnp.allclose(out, x)), "identity pass-through mismatch"

    print("KERNEL_OK")
</pallas_src>

<mosaic_0001>
module attributes {stable_mosaic.version = 11 : i64} {
  func.func @_copy_kernel(%arg0: i32, %arg1: memref<2x1024xf32, #tpu.memory_space<vmem>>, %arg2: memref<2x1024xf32, #tpu.memory_space<vmem>>) attributes {dimension_semantics = [#tpu.dimension_semantics<parallel>], iteration_bounds = array<i64: 1>, scalar_prefetch = 0 : i64, scratch_operands = 0 : i64, tpu.core_type = #tpu.core_type<tc>, window_params = [{transform_indices = @transform_0, window_bounds = array<i64: 2, 1024>}, {transform_indices = @transform_1, window_bounds = array<i64: 2, 1024>}]} {
    %c0 = arith.constant 0 : index
    %c0_0 = arith.constant 0 : index
    %0 = vector.load %arg1[%c0, %c0_0] : memref<2x1024xf32, #tpu.memory_space<vmem>>, vector<2x1024xf32>
    %c0_1 = arith.constant 0 : index
    %c0_2 = arith.constant 0 : index
    %1 = vector.load %arg2[%c0_1, %c0_2] : memref<2x1024xf32, #tpu.memory_space<vmem>>, vector<2x1024xf32>
    tpu.vector_store %arg2[%c0_1, %c0_2], %0 {strides = array<i32>} : memref<2x1024xf32, #tpu.memory_space<vmem>>, vector<2x1024xf32>,
    return
  }
  func.func @transform_0(%arg0: i32) -> (i32, i32) {
    %c0_i32 = arith.constant 0 : i32
    %c0_i32_0 = arith.constant 0 : i32
    return %arg0, %c0_i32 : i32, i32
  }
  func.func @transform_1(%arg0: i32) -> (i32, i32) {
    %c0_i32 = arith.constant 0 : i32
    %c0_i32_0 = arith.constant 0 : i32
    return %arg0, %c0_i32 : i32, i32
  }
}

</mosaic_0001>

<bundles_post_ra>
// kernel: application_forward.1
= control target key start
LH: loop header
LB: loop body
LE: loop exit
PB: predicated region body
PF: predicated region fallthrough
CT: control target
= control target key end

     0   :  { %s38_s0 = inlined_call_operand.vmem [shape: f32[2,1024], index: 0, kind: input, shape index: {}, may-alias: {0,1}]   ;;  %s39_s1 = inlined_call_operand.vmem [shape: f32[2,1024], index: 1, kind: output, shape index: {}, may-alias: {0,1}]  }
   0x1   :  { %v8_v0 = vld [vmem:[%s38_s0] sm:$0xff]  ;;  %v9_v1 = vld [vmem:[%s38_s0 + $0x8] sm:$0xff] }
   0x2   :  { %10 = vst [vmem:[%s39_s1] sm:$0xff] %v8_v0 }
   0x3   :  { %11 = vst [vmem:[%s39_s1 + $0x8] sm:$0xff] %v9_v1 }

</bundles_post_ra>
